<compile_context>
chip_gen: v7x
topology: tpu7x:2x2x1
jax: 0.10.0
libtpu: 0.0.40
codegen_flags: <defaults>
</compile_context>

<pallas_src>
import functools

import jax
import jax.numpy as jnp
from jax import lax
from jax.experimental import pallas as pl
from jax.experimental.pallas import tpu as pltpu


def _siglip_loss_kernel(scale_ref, bias_ref, img_ref, txt_ref, out_ref, acc_sm,
                        *, bf16_elementwise):
    i = pl.program_id(0)
    j = pl.program_id(1)
    nj = pl.num_programs(1)

    # Per-i-row-tile running sum lives in SMEM; zero it at the start of each
    # j sweep (j is the inner, "arbitrary" grid axis).
    @pl.when(j == 0)
    def _():
        acc_sm[0, 0] = jnp.float32(0.0)

    # MXU: contract the feature (lane) dims of both tiles in their native
    # (possibly bf16) dtype with f32 accumulation; no transpose of the txt tile.
    # (If lower_as_mlir ever shows a vxpose here, pre-transpose text_features to
    # (D, N) in the wrapper and use a (D, B_j) BlockSpec instead.)
    logits = lax.dot_general(
        img_ref[...], txt_ref[...],
        dimension_numbers=(((1,), (1,)), ((), ())),
        preferred_element_type=jnp.float32,
    )                                                   # (B_i, B_j) f32

    scale = scale_ref[0, 0]
    bias = bias_ref[0, 0]
    y = logits * scale + bias                           # scale the f32 logits tile

    # softplus(y) = max(y, 0) + log1p(exp(-|y|)); accumulate POSITIVE terms.
    if bf16_elementwise:
        # bf16 EUP/VPU path (use on v6e/v7x only); reduce in f32.
        yb = y.astype(jnp.bfloat16)
        sp = (jnp.maximum(yb, 0.0)
              + jnp.log1p(jnp.exp(-jnp.abs(yb)))).astype(jnp.float32)
    else:
        sp = jnp.maximum(y, 0.0) + jnp.log1p(jnp.exp(-jnp.abs(y)))
    part = jnp.sum(sp)

    acc_sm[0, 0] = acc_sm[0, 0] + part

    # Diagonal (label == +1) correction: softplus(-y) = softplus(y) - y, so
    # subtract the sum of GLOBAL-diagonal elements.  Only runs on tiles whose
    # global row range overlaps their global column range (block sizes may differ).
    bi, bj = y.shape
    row0 = i * bi
    col0 = j * bj
    overlaps = jnp.logical_and(row0 < col0 + bj, col0 < row0 + bi)

    @pl.when(overlaps)
    def _():
        rows = row0 + lax.broadcasted_iota(jnp.int32, (bi, bj), 0)
        cols = col0 + lax.broadcasted_iota(jnp.int32, (bi, bj), 1)
        diag_sum = jnp.sum(jnp.where(rows == cols, y, 0.0))
        acc_sm[0, 0] = acc_sm[0, 0] - diag_sum

    # Write the lane-dense output block once, at the end of the j sweep.
    @pl.when(j == nj - 1)
    def _():
        out_ref[...] = jnp.full(out_ref.shape, acc_sm[0, 0], dtype=out_ref.dtype)


def _largest_divisor(n, candidates, cap):
    for t in candidates:
        if t <= cap and n % t == 0:
            return t
    return n


def _pick_blocks(n, d, feat_bytes):
    # Large img row-tile B_i; keep >= 2 i-tiles (v7x megacore) when possible.
    bi_cap = n // 2 if n >= 256 else n
    bi = _largest_divisor(n, (2048, 1024, 512, 256, 128, 64, 32, 16), bi_cap)
    bj = _largest_divisor(n, (512, 256, 128, 64, 32, 16), n)

    # Shrink against a conservative ~40 MiB VMEM budget (v7x: 64 MiB physical).
    def need(bi_, bj_):
        return 4 * (bi_ + bj_) * d * feat_bytes + 4 * bi_ * bj_ * 4

    while need(bi, bj) > 40 * 1024 * 1024 and bi > 128 and bi % 2 == 0:
        bi //= 2
    while need(bi, bj) > 40 * 1024 * 1024 and bj > 128 and bj % 2 == 0:
        bj //= 2
    return bi, bj


def siglip_loss(image_features, text_features, logit_scale, logit_bias,
                block_i=None, block_j=None, bf16_elementwise=False):
    """image_features, text_features: [N, D] (f32 or bf16); logit_scale/bias: scalars."""
    n, d = image_features.shape
    assert text_features.shape == (n, d)
    assert image_features.dtype == text_features.dtype
    feat_bytes = jnp.dtype(image_features.dtype).itemsize

    if block_i is None or block_j is None:
        auto_i, auto_j = _pick_blocks(n, d, feat_bytes)
        block_i = auto_i if block_i is None else block_i
        block_j = auto_j if block_j is None else block_j
    assert n % block_i == 0 and n % block_j == 0, "N must be divisible by block sizes"
    num_i = n // block_i
    num_j = n // block_j

    scale_arr = jnp.asarray(logit_scale, jnp.float32).reshape(1, 1)
    bias_arr = jnp.asarray(logit_bias, jnp.float32).reshape(1, 1)

    # Double-buffered feature tiles + f32 elementwise temporaries + out block.
    vmem_need = (2 * 2 * (block_i + block_j) * d * feat_bytes
                 + 4 * block_i * block_j * 4
                 + 2 * 8 * 128 * 4)
    vmem_limit = int(min(max(int(vmem_need * 1.25), 32 * 1024 * 1024),
                         48 * 1024 * 1024))

    cost = pl.CostEstimate(
        flops=2 * n * n * d + 8 * n * n,
        transcendentals=2 * n * n,
        bytes_accessed=int(n * d * feat_bytes            # img: read once
                           + num_i * n * d * feat_bytes  # txt: re-read per i tile
                           + num_i * 8 * 128 * 4),       # partial-sum output
    )

    kernel = functools.partial(_siglip_loss_kernel,
                               bf16_elementwise=bool(bf16_elementwise))

    partials = pl.pallas_call(
        kernel,
        out_shape=jax.ShapeDtypeStruct((num_i, 8, 128), jnp.float32),
        grid=(num_i, num_j),
        in_specs=[
            pl.BlockSpec(memory_space=pltpu.SMEM),                # logit_scale (1,1)
            pl.BlockSpec(memory_space=pltpu.SMEM),                # logit_bias  (1,1)
            pl.BlockSpec((block_i, d), lambda i, j: (i, 0)),      # img row-tile
            # TODO(synk): on v5e, if profiling shows exposed txt DMA, add
            # pipeline_mode=pl.Buffered(3) to this txt BlockSpec.
            pl.BlockSpec((block_j, d), lambda i, j: (j, 0)),      # txt row-tile
        ],
        out_specs=pl.BlockSpec((1, 8, 128), lambda i, j: (i, 0, 0)),
        scratch_shapes=[pltpu.SMEM((1, 1), jnp.float32)],
        compiler_params=pltpu.CompilerParams(
            dimension_semantics=("parallel", "arbitrary"),
            vmem_limit_bytes=vmem_limit),
        cost_estimate=cost,
    )(scale_arr, bias_arr, image_features, text_features)

    # Tiny final reduce + normalization by the GLOBAL batch size.  Positive
    # softplus terms were accumulated, so no extra negation is needed.
    return jnp.sum(partials[:, 0, 0]) / jnp.float32(n)


def _siglip_loss_ref(image_features, text_features, logit_scale, logit_bias):
    img = image_features.astype(jnp.float32)
    txt = text_features.astype(jnp.float32)
    logits = logit_scale * jnp.dot(img, txt.T, precision=lax.Precision.HIGHEST) + logit_bias
    n = img.shape[0]
    labels = 2.0 * jnp.eye(n, dtype=jnp.float32) - 1.0
    return -jnp.sum(jax.nn.log_sigmoid(labels * logits)) / n


if __name__ == "__main__":
    key = jax.random.PRNGKey(0)
    k1, k2 = jax.random.split(key)

    N, D = 256, 64
    image_features = jax.random.normal(k1, (N, D), dtype=jnp.float32)
    text_features = jax.random.normal(k2, (N, D), dtype=jnp.float32)
    # L2-normalize as SigLIP features typically are (deterministic setup).
    image_features = image_features / jnp.linalg.norm(image_features, axis=-1, keepdims=True)
    text_features = text_features / jnp.linalg.norm(text_features, axis=-1, keepdims=True)

    # Chosen so diagonal logits are clearly nonzero (exercises the diag correction).
    logit_scale = jnp.float32(8.0)
    logit_bias = jnp.float32(-5.0)

    ref = _siglip_loss_ref(image_features, text_features, logit_scale, logit_bias)

    # 1) f32 features, square 128x128 tiles -> 2x2 grid: exercises diagonal and
    #    off-diagonal tiles plus the per-row-tile SMEM accumulator.  Tight check.
    loss = siglip_loss(image_features, text_features, logit_scale, logit_bias,
                       block_i=128, block_j=128)
    loss = jax.block_until_ready(loss)
    assert jnp.allclose(loss, ref, rtol=1e-3, atol=1e-3), (loss, ref)

    # 2) bf16 features (halved HBM traffic, bf16 MXU path), rectangular 128x64
    #    tiles -> partial-diagonal overlaps.  Loose check vs the f32 reference.
    loss_bf16 = siglip_loss(image_features.astype(jnp.bfloat16),
                            text_features.astype(jnp.bfloat16),
                            logit_scale, logit_bias, block_i=128, block_j=64)
    loss_bf16 = jax.block_until_ready(loss_bf16)
    assert jnp.allclose(loss_bf16, ref, rtol=3e-2, atol=3e-2), (loss_bf16, ref)

    # 3) Auto block picking + bf16 elementwise (v6e/v7x EUP fast path).  Loose check.
    loss_ew = siglip_loss(image_features, text_features, logit_scale, logit_bias,
                          bf16_elementwise=True)
    loss_ew = jax.block_until_ready(loss_ew)
    assert jnp.allclose(loss_ew, ref, rtol=2e-2, atol=2e-2), (loss_ew, ref)

    print("KERNEL_OK")
</pallas_src>

<mosaic_0001>
module attributes {stable_mosaic.version = 11 : i64} {
  func.func @_siglip_loss_kernel(%arg0: i32, %arg1: i32, %arg2: memref<1x1xf32, #tpu.memory_space<smem>>, %arg3: memref<1x1xf32, #tpu.memory_space<smem>>, %arg4: memref<128x64xf32, #tpu.memory_space<vmem>>, %arg5: memref<128x64xf32, #tpu.memory_space<vmem>>, %arg6: memref<1x8x128xf32, #tpu.memory_space<vmem>>, %arg7: memref<1x1xf32, #tpu.memory_space<smem>>) attributes {dimension_semantics = [#tpu.dimension_semantics<parallel>, #tpu.dimension_semantics<arbitrary>], iteration_bounds = array<i64: 2, 2>, scalar_prefetch = 0 : i64, scratch_operands = 1 : i64, tpu.core_type = #tpu.core_type<tc>, window_params = [{transform_indices = @transform_0, window_bounds = array<i64: 1, 1>}, {transform_indices = @transform_1, window_bounds = array<i64: 1, 1>}, {transform_indices = @transform_2, window_bounds = array<i64: 128, 64>}, {transform_indices = @transform_3, window_bounds = array<i64: 128, 64>}, {transform_indices = @transform_4, window_bounds = array<i64: 1, 8, 128>}]} {
    %c0_i32 = arith.constant 0 : i32
    %0 = arith.cmpi eq, %arg1, %c0_i32 : i32
    %1 = arith.extui %0 : i1 to i32
    %c0_i32_0 = arith.constant 0 : i32
    %2 = arith.cmpi ne, %1, %c0_i32_0 : i32
    scf.if %2 {
      %cst_20 = arith.constant 0.000000e+00 : f32
      %c0_21 = arith.constant 0 : index
      %c0_22 = arith.constant 0 : index
      %39 = memref.load %arg7[%c0_21, %c0_22] : memref<1x1xf32, #tpu.memory_space<smem>>
      memref.store %cst_20, %arg7[%c0_21, %c0_22] : memref<1x1xf32, #tpu.memory_space<smem>>
    } else {
    }
    %c0 = arith.constant 0 : index
    %c0_1 = arith.constant 0 : index
    %3 = vector.load %arg4[%c0, %c0_1] : memref<128x64xf32, #tpu.memory_space<vmem>>, vector<128x64xf32>
    %c0_2 = arith.constant 0 : index
    %c0_3 = arith.constant 0 : index
    %4 = vector.load %arg5[%c0_2, %c0_3] : memref<128x64xf32, #tpu.memory_space<vmem>>, vector<128x64xf32>
    %cst = arith.constant dense<0.000000e+00> : vector<128x128xf32>
    %5 = tpu.matmul %3, %4, %cst {dimension_numbers = #tpu.dot_dimension_numbers<[1], [1], [0], [0], [0, 0, 1, 0], [], []>} : vector<128x64xf32>, vector<128x64xf32>, vector<128x128xf32> -> vector<128x128xf32>
    %c0_4 = arith.constant 0 : index
    %c0_5 = arith.constant 0 : index
    %6 = memref.load %arg2[%c0_4, %c0_5] : memref<1x1xf32, #tpu.memory_space<smem>>
    %c0_6 = arith.constant 0 : index
    %c0_7 = arith.constant 0 : index
    %7 = memref.load %arg3[%c0_6, %c0_7] : memref<1x1xf32, #tpu.memory_space<smem>>
    %8 = vector.broadcast %6 : f32 to vector<128x128xf32>
    %9 = arith.mulf %5, %8 : vector<128x128xf32>
    %10 = vector.broadcast %7 : f32 to vector<128x128xf32>
    %11 = arith.addf %9, %10 : vector<128x128xf32>
    %cst_8 = arith.constant 0.000000e+00 : f32
    %12 = vector.broadcast %cst_8 : f32 to vector<128x128xf32>
    %13 = arith.maximumf %11, %12 : vector<128x128xf32>
    %14 = math.absf %11 : vector<128x128xf32>
    %cst_9 = arith.constant 0.000000e+00 : f32
    %15 = vector.broadcast %cst_9 : f32 to vector<128x128xf32>
    %16 = arith.subf %15, %14 : vector<128x128xf32>
    %17 = math.exp %16 : vector<128x128xf32>
    %18 = math.log1p %17 : vector<128x128xf32>
    %19 = arith.addf %13, %18 : vector<128x128xf32>
    %20 = vector.shape_cast %19 : vector<128x128xf32> to vector<1x128x128xf32>
    %cst_10 = arith.constant dense<0.000000e+00> : vector<1xf32>
    %21 = vector.multi_reduction <add>, %20, %cst_10 [1, 2] : vector<1x128x128xf32> to vector<1xf32>
    %22 = vector.shape_cast %21 : vector<1xf32> to vector<1x1x1xf32>
    %23 = vector.extract %22[0, 0, 0] : f32 from vector<1x1x1xf32>
    %c0_11 = arith.constant 0 : index
    %c0_12 = arith.constant 0 : index
    %24 = memref.load %arg7[%c0_11, %c0_12] : memref<1x1xf32, #tpu.memory_space<smem>>
    %25 = arith.addf %24, %23 : f32
    %c0_13 = arith.constant 0 : index
    %c0_14 = arith.constant 0 : index
    %26 = memref.load %arg7[%c0_13, %c0_14] : memref<1x1xf32, #tpu.memory_space<smem>>
    memref.store %25, %arg7[%c0_13, %c0_14] : memref<1x1xf32, #tpu.memory_space<smem>>
    %c128_i32 = arith.constant 128 : i32
    %27 = arith.muli %arg0, %c128_i32 : i32
    %c128_i32_15 = arith.constant 128 : i32
    %28 = arith.muli %arg1, %c128_i32_15 : i32
    %c128_i32_16 = arith.constant 128 : i32
    %29 = arith.addi %28, %c128_i32_16 : i32
    %30 = arith.cmpi slt, %27, %29 : i32
    %c128_i32_17 = arith.constant 128 : i32
    %31 = arith.addi %27, %c128_i32_17 : i32
    %32 = arith.cmpi slt, %28, %31 : i32
    %33 = arith.andi %30, %32 : i1
    %34 = arith.extui %33 : i1 to i32
    %c0_i32_18 = arith.constant 0 : i32
    %35 = arith.cmpi ne, %34, %c0_i32_18 : i32
    scf.if %35 {
      %39 = tpu.iota {dimensions = array<i32: 0>} : vector<128x128xi32>
      %40 = vector.broadcast %27 : i32 to vector<128x128xi32>
      %41 = arith.addi %40, %39 : vector<128x128xi32>
      %42 = tpu.iota {dimensions = array<i32: 1>} : vector<128x128xi32>
      %43 = vector.broadcast %28 : i32 to vector<128x128xi32>
      %44 = arith.addi %43, %42 : vector<128x128xi32>
      %45 = arith.cmpi eq, %41, %44 : vector<128x128xi32>
      %cst_20 = arith.constant 0.000000e+00 : f32
      %46 = vector.broadcast %cst_20 : f32 to vector<128x128xf32>
      %47 = arith.select %45, %11, %46 : vector<128x128xi1>, vector<128x128xf32>
      %48 = vector.shape_cast %47 : vector<128x128xf32> to vector<1x128x128xf32>
      %cst_21 = arith.constant dense<0.000000e+00> : vector<1xf32>
      %49 = vector.multi_reduction <add>, %48, %cst_21 [1, 2] : vector<1x128x128xf32> to vector<1xf32>
      %50 = vector.shape_cast %49 : vector<1xf32> to vector<1x1x1xf32>
      %51 = vector.extract %50[0, 0, 0] : f32 from vector<1x1x1xf32>
      %c0_22 = arith.constant 0 : index
      %c0_23 = arith.constant 0 : index
      %52 = memref.load %arg7[%c0_22, %c0_23] : memref<1x1xf32, #tpu.memory_space<smem>>
      %53 = arith.subf %52, %51 : f32
      %c0_24 = arith.constant 0 : index
      %c0_25 = arith.constant 0 : index
      %54 = memref.load %arg7[%c0_24, %c0_25] : memref<1x1xf32, #tpu.memory_space<smem>>
      memref.store %53, %arg7[%c0_24, %c0_25] : memref<1x1xf32, #tpu.memory_space<smem>>
    } else {
    }
    %c1_i32 = arith.constant 1 : i32
    %36 = arith.cmpi eq, %arg1, %c1_i32 : i32
    %37 = arith.extui %36 : i1 to i32
    %c0_i32_19 = arith.constant 0 : i32
    %38 = arith.cmpi ne, %37, %c0_i32_19 : i32
    scf.if %38 {
      %c0_20 = arith.constant 0 : index
      %c0_21 = arith.constant 0 : index
      %39 = memref.load %arg7[%c0_20, %c0_21] : memref<1x1xf32, #tpu.memory_space<smem>>
      %40 = vector.broadcast %39 : f32 to vector<1x8x128xf32>
      %c0_22 = arith.constant 0 : index
      %c0_23 = arith.constant 0 : index
      %c0_24 = arith.constant 0 : index
      %41 = vector.load %arg6[%c0_22, %c0_23, %c0_24] : memref<1x8x128xf32, #tpu.memory_space<vmem>>, vector<1x8x128xf32>
      tpu.vector_store %arg6[%c0_22, %c0_23, %c0_24], %40 {strides = array<i32>} : memref<1x8x128xf32, #tpu.memory_space<vmem>>, vector<1x8x128xf32>,
    } else {
    }
    return
  }
  func.func @transform_0(%arg0: i32, %arg1: i32) -> (i32, i32) {
    %c0_i32 = arith.constant 0 : i32
    %c0_i32_0 = arith.constant 0 : i32
    %c0_i32_1 = arith.constant 0 : i32
    return %c0_i32, %c0_i32_0 : i32, i32
  }
  func.func @transform_1(%arg0: i32, %arg1: i32) -> (i32, i32) {
    %c0_i32 = arith.constant 0 : i32
    %c0_i32_0 = arith.constant 0 : i32
    %c0_i32_1 = arith.constant 0 : i32
    return %c0_i32, %c0_i32_0 : i32, i32
  }
  func.func @transform_2(%arg0: i32, %arg1: i32) -> (i32, i32) {
    %c0_i32 = arith.constant 0 : i32
    %c0_i32_0 = arith.constant 0 : i32
    return %arg0, %c0_i32 : i32, i32
  }
  func.func @transform_3(%arg0: i32, %arg1: i32) -> (i32, i32) {
    %c0_i32 = arith.constant 0 : i32
    %c0_i32_0 = arith.constant 0 : i32
    return %arg1, %c0_i32 : i32, i32
  }
  func.func @transform_4(%arg0: i32, %arg1: i32) -> (i32, i32, i32) {
    %c0_i32 = arith.constant 0 : i32
    %c0_i32_0 = arith.constant 0 : i32
    %c0_i32_1 = arith.constant 0 : i32
    return %arg0, %c0_i32, %c0_i32_0 : i32, i32, i32
  }
}

</mosaic_0001>

<bundles_post_ra>
// kernel: tpu_custom_call.1
= control target key start
LH: loop header
LB: loop body
LE: loop exit
PB: predicated region body
PF: predicated region fallthrough
CT: control target
= control target key end

     0   :  { %s2090_s0 = inlined_call_operand.<no memory space> [shape: f32[1,1], index: 0, kind: input, shape index: {}]   ;;  %s2091_s1 = inlined_call_operand.<no memory space> [shape: f32[1,1], index: 1, kind: input, shape index: {}]   ;;  %s2092_s2 = inlined_call_operand.vmem [shape: f32[256,64], index: 2, kind: input, shape index: {}]   ;;  %s2093_s3 = inlined_call_operand.vmem [shape: f32[256,64], index: 3, kind: input, shape index: {}]   ;;  %s2094_s4 = inlined_call_operand.hbm [shape: f32[2,8,128], index: 4, kind: output, shape index: {}]  }
   0x1   :  { %9 = sst [smem:[#allocation3]] %s2090_s0 }
   0x2   :  { %10 = sst [smem:[#allocation4]] %s2091_s1 }
   0x3   :  { %11 = vsyncpa [#allocation6], 0 }
   0x4   :  { %13 = vsyncpa [#allocation6 + $0x1], 0  ;;  %s1502_s19 = smov 0   ;;  %s1504_s20 = smov 0  }
   0x5   :  { %s1506_s21 = smov 0   ;;  %s1508_s22 = smov 0  }
   0x6   :  { %s1510_s23 = smov 0   ;;  %s1512_s24 = smov 0  }
   0x7   :  { %s1514_s25 = smov 0   ;;  %s1516_s0 = smov 0  }
   0x8 LB: > { %s1028_s1 = sadd.s32 4294967295, %s1467_s0   ;;  %s1029_s26 = sadd.s32 4294967294, %s1467_s0   ;;  %s1467_s0 = sphi %s1516_s0, %s19_s0   ;;  %s1463_s25 = sphi %s1514_s25, %s2123_s25   ;;  %s1459_s24 = sphi %s1512_s24, %s2122_s24   ;;  %s1455_s23 = sphi %s1510_s23, %s2121_s23   ;;  %s1451_s22 = sphi %s1508_s22, %s2120_s22   ;;  %s1447_s21 = sphi %s1506_s21, %s2119_s21   ;;  %s1443_s20 = sphi %s1504_s20, %s2118_s20   ;;  %s1439_s19 = sphi %s1502_s19, %s2117_s19  }
   0x9   : > { %s28_s27 = sadd.s32 1, %s1459_s24  ;;  %s31_s28 = sadd.s32 1, %s1463_s25 }
   0xa   : > { %p29_p0 = scmp.ge.s32.totalorder %s28_s27, 2  ;;  %p142_p1 = scmp.ne.s32.totalorder %s1447_s21, %s1443_s20 }
   0xb   : > { %p143_p2 = scmp.eq.s32.totalorder %s1028_s1, 3  ;;  %p148_p4 = scmp.ne.s32.totalorder %s1443_s20, %s1439_s19 }
   0xc   : > { %s2125_s27 = smov (%p29_p0, %s28_s27), 0  ;;  %s2127_s28 = smov (!%p29_p0, %s31_s28), %s1463_s25 }
   0xd   : > { %p1551_p3 = por %p143_p2, %p142_p1  ;;  %p33_p5 = scmp.ge.s32.totalorder %s2127_s28, 2 }
   0xe   : > { %p149_p6 = scmp.eq.s32.totalorder %s1029_s26, 3  ;;  %p1032_p7 = scmp.ge.s32.totalorder %s1467_s0, 1 }
   0xf   : > { %p191_p8 = scmp.lt.s32.totalorder %s1467_s0, 5  ;;  %s2129_s28 = smov (%p33_p5, %s2127_s28), 0 }
  0x10   : > { %p1561_p9 = por %p149_p6, %p148_p4  ;;  %s129_s5 = ssub.s32 %s1463_s25, %s2129_s28 }
  0x11   : > { %p192_p10 = pnand %p1032_p7, %p191_p8  ;;  %s132_s6 = sadd.s32 1, %s1447_s21 }
  0x12   : > { %p130_p11 = scmp.eq.s32.totalorder %s129_s5, 0  ;;  %s219_s8 = sand.u32 (!%p192_p10), 1, %s1443_s20   ;;  %vm272_vm0 = vcmask (!%p192_p10), 523264  }
  0x13   : > { %195 = sbr.rel (%p192_p10) target bundleno = 809 (0x329), region = 36  ;;  %s1036_s9 = sshll.u32 (!%p192_p10), %s1451_s22, 4  ;;  %vm1585_vm1 = vmpackc.low (!%p192_p10), %vm272_vm0, %vm272_vm0 }
  0x14   : > { %s1569_s7 = scalar_select %p130_p11, %s1447_s21, %s132_s6  }
  0x15   : > { %s1575_s10 = sshll.u32 (!%p192_p10), %s219_s8, 3  ;;  %p229_p12 = scmp.lt.s32.totalorder (!%p192_p10), %s1036_s9, 31 }
  0x16   : > { %s1034_s11 = sshll.u32 (!%p192_p10), %s1455_s23, 4  ;;  %s514_s26 = sld [smem:[#allocation3]] (!%p192_p10) }
  0x17   : > { %p223_p13 = scmp.lt.s32.totalorder (!%p192_p10), %s1034_s11, 31  ;;  %s515_s5 = sld [smem:[#allocation4]] (!%p192_p10) }
  0x18   : > { %p1242_p0 = scmp.eq.s32.totalorder (!%p192_p10), %s1451_s22, 0  ;;  %s1469_s6 = smov (!%p192_p10), 0.0  }
  0x19   : > { %s221_s18 = scalar_lea.vmem (!%p192_p10), [#allocation5], %s1575_s10 }
  0x1a   : > { %s2131_s9 = smov (!%p229_p12, %s1036_s9), 31  ;;  %s2133_s11 = smov (!%p223_p13, %s1034_s11), 31 }
  0x1b   : > { %s1037_s12 = sshll.u32 %s2131_s9, 3  ;;  %s1035_s16 = sshll.u32 %s2133_s11, 3 }
  0x1c   : > { %s1581_s15 = scalar_lea.vmem %s2093_s3, %s1037_s12  ;;  %s1600_s1 = scalar_lea.vmem %s2092_s2, %s1035_s16  ;;  %v1706_v41 = vstv %s514_s26 }
  0x1d   : > { %v256_v1 = vld [vmem:[%s1581_s15] sm:$0xff]  ;;  %v257_v2 = vld [vmem:[%s1581_s15 + $0x8] sm:$0xff]  ;;  %v258_v3 = vld [vmem:[%s1581_s15 + $0x10] sm:$0xff]  ;;  %v1708_v43 = vstv %s515_s5  ;;  %1235 = sst [smem:[#allocation2]] (%p1242_p0), %s1469_s6  ;;  %s1956_s9 = sshll.u32 %s1455_s23, 7 }
  0x1e   : > { %v1166_v4 = vpack.c.bf16 %v257_v2, %v256_v1  ;;  %v259_v5 = vld [vmem:[%s1581_s15 + $0x18] sm:$0xff]  ;;  %v240_v7 = vld [vmem:[%s1600_s1] sm:$0xff]  ;;  %v261_v10 = vld [vmem:[%s1581_s15 + $0x28] sm:$0xff]  ;;  %s1072_s11 = sshll.u32 %s1451_s22, 7  ;;  %s822_s13 = sadd.s32 128, %s1956_s9 }
  0x1f   : > { %v1172_v6 = vpack.c.bf16 %v259_v5, %v258_v3  ;;  %v248_v8 = vld [vmem:[%s1600_s1 + $0x40] sm:$0xff]  ;;  %1142 = vmatprep.mubr.msk.f32.mxu0 %vm272_vm0, %v240_v7  ;;  %v262_v12 = vld [vmem:[%s1581_s15 + $0x30] sm:$0xff]  ;;  %v263_v13 = vld [vmem:[%s1581_s15 + $0x38] sm:$0xff]  ;;  %s820_s12 = sadd.s32 128, %s1072_s11  ;;  %p1965_p2 = scmp.lt.s32.totalorder %s1072_s11, %s822_s13 }
  0x20   : > { %1168 = vmatprep.subr.msk.bf16.mxu0 %vm1585_vm1, %v1166_v4  ;;  %1214 = vmatprep.subr.msk.bf16.mxu1 %vm1585_vm1, %v1166_v4  ;;  %v260_v9 = vld [vmem:[%s1581_s15 + $0x20] sm:$0xff]  ;;  %v1184_v14 = vpack.c.bf16 %v263_v13, %v262_v12  ;;  %v265_v16 = vld [vmem:[%s1581_s15 + $0x48] sm:$0xff]  ;;  %v266_v18 = vld [vmem:[%s1581_s15 + $0x50] sm:$0xff]  ;;  %p1961_p1 = scmp.lt.s32.totalorder %s1956_s9, %s820_s12  ;;  %s814_s23 = sld [smem:[#allocation2]] }
  0x21   : > { %1171 = vmatpush3.bf16.xpose.msk.msra.mxu0 %vm1585_vm1, %v1166_v4  ;;  %1222 = vmatpush3.bf16.xpose.msk.msra.mxu1 %vm1585_vm1, %v1166_v4  ;;  %v1178_v11 = vpack.c.bf16 %v261_v10, %v260_v9  ;;  %v264_v15 = vld [vmem:[%s1581_s15 + $0x40] sm:$0xff]  ;;  %v267_v19 = vld [vmem:[%s1581_s15 + $0x58] sm:$0xff]  ;;  %v269_v22 = vld [vmem:[%s1581_s15 + $0x68] sm:$0xff] }
  0x22   : > { %1174 = vmatprep.subr.msk.bf16.mxu0 %vm1585_vm1, %v1172_v6  ;;  %1215 = vmatprep.subr.msk.bf16.mxu1 %vm1585_vm1, %v1172_v6  ;;  %v1190_v17 = vpack.c.bf16 %v265_v16, %v264_v15  ;;  %v1196_v20 = vpack.c.bf16 %v267_v19, %v266_v18  ;;  %v268_v21 = vld [vmem:[%s1581_s15 + $0x60] sm:$0xff]  ;;  %v270_v24 = vld [vmem:[%s1581_s15 + $0x70] sm:$0xff]  ;;  %v271_v25 = vld [vmem:[%s1581_s15 + $0x78] sm:$0xff]  ;;  %p824_p4 = pnand %p1965_p2, %p1961_p1 }
  0x23   : > { %1154 = vmatprep.mubr.msk.f32.mxu1 %vm272_vm0, %v248_v8  ;;  %v1202_v23 = vpack.c.bf16 %v269_v22, %v268_v21  ;;  %v1208_v26 = vpack.c.bf16 %v271_v25, %v270_v24  ;;  %v241_v27 = vld [vmem:[%s1600_s1 + $0x8] sm:$0xff]  ;;  %v242_v29 = vld [vmem:[%s1600_s1 + $0x10] sm:$0xff]  ;;  %v243_v31 = vld [vmem:[%s1600_s1 + $0x18] sm:$0xff] }
  0x24   : > { %v249_v28 = vld [vmem:[%s1600_s1 + $0x48] sm:$0xff]  ;;  %v250_v30 = vld [vmem:[%s1600_s1 + $0x50] sm:$0xff]  ;;  %v251_v32 = vld [vmem:[%s1600_s1 + $0x58] sm:$0xff] }
  0x25   : > { %v244_v33 = vld [vmem:[%s1600_s1 + $0x20] sm:$0xff]  ;;  %v245_v35 = vld [vmem:[%s1600_s1 + $0x28] sm:$0xff]  ;;  %v246_v37 = vld [vmem:[%s1600_s1 + $0x30] sm:$0xff] }
  0x26   : > { %v252_v34 = vld [vmem:[%s1600_s1 + $0x60] sm:$0xff]  ;;  %v253_v36 = vld [vmem:[%s1600_s1 + $0x68] sm:$0xff]  ;;  %v254_v38 = vld [vmem:[%s1600_s1 + $0x70] sm:$0xff] }
  0x27   : > { %v247_v39 = vld [vmem:[%s1600_s1 + $0x38] sm:$0xff] }
  0x28   : > { %v255_v40 = vld [vmem:[%s1600_s1 + $0x78] sm:$0xff] }
  0x29   : > { %1177 = vmatpush3.bf16.xpose.msk.msra.mxu0 %vm1585_vm1, %v1172_v6  ;;  %1223 = vmatpush3.bf16.xpose.msk.msra.mxu1 %vm1585_vm1, %v1172_v6 }
  0x2a   : > { %1180 = vmatprep.subr.msk.bf16.mxu0 %vm1585_vm1, %v1178_v11  ;;  %1216 = vmatprep.subr.msk.bf16.mxu1 %vm1585_vm1, %v1178_v11 }
  0x31   : > { %1183 = vmatpush3.bf16.xpose.msk.msra.mxu0 %vm1585_vm1, %v1178_v11  ;;  %1224 = vmatpush3.bf16.xpose.msk.msra.mxu1 %vm1585_vm1, %v1178_v11 }
  0x32   : > { %1186 = vmatprep.subr.msk.bf16.mxu0 %vm1585_vm1, %v1184_v14  ;;  %1217 = vmatprep.subr.msk.bf16.mxu1 %vm1585_vm1, %v1184_v14 }
  0x39   : > { %1189 = vmatpush3.bf16.xpose.msk.msra.mxu0 %vm1585_vm1, %v1184_v14  ;;  %1225 = vmatpush3.bf16.xpose.msk.msra.mxu1 %vm1585_vm1, %v1184_v14 }
  0x3a   : > { %1192 = vmatprep.subr.msk.bf16.mxu0 %vm1585_vm1, %v1190_v17  ;;  %1218 = vmatprep.subr.msk.bf16.mxu1 %vm1585_vm1, %v1190_v17 }
  0x41   : > { %1195 = vmatpush3.bf16.xpose.msk.msra.mxu0 %vm1585_vm1, %v1190_v17  ;;  %1226 = vmatpush3.bf16.xpose.msk.msra.mxu1 %vm1585_vm1, %v1190_v17 }
  0x42   : > { %1198 = vmatprep.subr.msk.bf16.mxu0 %vm1585_vm1, %v1196_v20  ;;  %1219 = vmatprep.subr.msk.bf16.mxu1 %vm1585_vm1, %v1196_v20 }
  0x49   : > { %1201 = vmatpush3.bf16.xpose.msk.msra.mxu0 %vm1585_vm1, %v1196_v20  ;;  %1227 = vmatpush3.bf16.xpose.msk.msra.mxu1 %vm1585_vm1, %v1196_v20 }
  0x4a   : > { %1204 = vmatprep.subr.msk.bf16.mxu0 %vm1585_vm1, %v1202_v23  ;;  %1220 = vmatprep.subr.msk.bf16.mxu1 %vm1585_vm1, %v1202_v23 }
  0x51   : > { %1207 = vmatpush3.bf16.xpose.msk.msra.mxu0 %vm1585_vm1, %v1202_v23  ;;  %1228 = vmatpush3.bf16.xpose.msk.msra.mxu1 %vm1585_vm1, %v1202_v23 }
  0x52   : > { %1210 = vmatprep.subr.msk.bf16.mxu0 %vm1585_vm1, %v1208_v26  ;;  %1221 = vmatprep.subr.msk.bf16.mxu1 %vm1585_vm1, %v1208_v26 }
  0x59   : > { %1213 = vmatpush3.bf16.xpose.msk.msra.mxu0 %vm1585_vm1, %v1208_v26  ;;  %1229 = vmatpush3.bf16.xpose.msk.msra.mxu1 %vm1585_vm1, %v1208_v26 }
  0x60   : > { %1143 = vmatmul.mubr.msk.f32.vlgmr.msra.gmra.mrb[0].mxu0 %vm272_vm0, %v241_v27  ;;  %1155 = vmatmul.mubr.msk.f32.vlgmr.msra.gmra.mrb[0].mxu1 %vm272_vm0, %v249_v28 }
  0x61   : > { %1145 = vmatprep.mubr.msk.f32.mxu0 %vm272_vm0, %v242_v29  ;;  %1157 = vmatprep.mubr.msk.f32.mxu1 %vm272_vm0, %v250_v30 }
  0x64   : > { %1146 = vmatmul.mubr.msk.f32.gmra.mrb[2].mxu0 %vm272_vm0, %v243_v31  ;;  %1158 = vmatmul.mubr.msk.f32.gmra.mrb[2].mxu1 %vm272_vm0, %v251_v32 }
  0x65   : > { %1148 = vmatprep.mubr.msk.f32.mxu0 %vm272_vm0, %v244_v33  ;;  %1160 = vmatprep.mubr.msk.f32.mxu1 %vm272_vm0, %v252_v34 }
  0x68   : > { %1149 = vmatmul.mubr.msk.f32.gmra.mrb[4].mxu0 %vm272_vm0, %v245_v35  ;;  %1161 = vmatmul.mubr.msk.f32.gmra.mrb[4].mxu1 %vm272_vm0, %v253_v36 }
  0x69   : > { %1151 = vmatprep.mubr.msk.f32.mxu0 %vm272_vm0, %v246_v37  ;;  %1163 = vmatprep.mubr.msk.f32.mxu1 %vm272_vm0, %v254_v38 }
  0x6c   : > { %1152 = vmatmul.mubr.msk.f32.gmra.mrb[6].mxu0 %vm272_vm0, %v247_v39  ;;  %1164 = vmatmul.mubr.msk.f32.gmra.mrb[6].mxu1 %vm272_vm0, %v255_v40 }
 0x133   : > { %v1144_v42 = vpop.f32.mrb[0].mxu0  ;;  %v1156_v44 = vpop.f32.mrb[0].mxu1 }
 0x134   : > { %v518_v45 = vmul.f32 %v1144_v42, %v1706_v41  ;;  %v435_v46 = vpop.f32.mrb[1].mxu0  ;;  %v475_v47 = vpop.f32.mrb[1].mxu1  ;;  %v526_v11 = vmul.f32 %v1156_v44, %v1706_v41 }
 0x135   : > { %v517_v48 = vmul.f32 %v1706_v41, %v435_v46  ;;  %v525_v15 = vmul.f32 %v1706_v41, %v475_v47 }
 0x136   : > { %v1713_v49 = vadd.f32 %v1708_v43, %v518_v45  ;;  %v1746_v18 = vadd.f32 %v1708_v43, %v526_v11 }
 0x137   : > { %v1716_v50 = vadd.f32 %v1708_v43, %v517_v48  ;;  %v1147_v51 = vpop.f32.mrb[2].mxu0  ;;  %v1159_v52 = vpop.f32.mrb[2].mxu1  ;;  %v1749_v19 = vadd.f32 %v1708_v43, %v525_v15 }
 0x138   : > { %v567_v53 = vand.u32 2147483647, %v1713_v49  ;;  %v520_v56 = vmul.f32 %v1147_v51, %v1706_v41  ;;  %v445_v57 = vpop.f32.mrb[3].mxu0  ;;  %v485_v58 = vpop.f32.mrb[3].mxu1  ;;  %v575_v23 = vand.u32 2147483647, %v1746_v18  ;;  %v528_v30 = vmul.f32 %v1159_v52, %v1706_v41 }
 0x139   : > { %v566_v54 = vand.u32 2147483647, %v1716_v50  ;;  %v519_v60 = vmul.f32 %v1706_v41, %v445_v57  ;;  %v574_v27 = vand.u32 2147483647, %v1749_v19  ;;  %v527_v38 = vmul.f32 %v1706_v41, %v485_v58 }
 0x13a   : > { %v583_v55 = vsub.f32 0.0, %v567_v53  ;;  %v1725_v0 = vadd.f32 %v1708_v43, %v520_v56  ;;  %v591_v29 = vsub.f32 0.0, %v575_v23  ;;  %v1769_v42 = vadd.f32 %v1708_v43, %v528_v30 }
 0x13b   : > { %v582_v59 = vsub.f32 0.0, %v566_v54  ;;  %v1150_v61 = vpop.f32.mrb[4].mxu0  ;;  %v1722_v62 = vpop.f32.mrb[4].mxu1  ;;  %v1730_v4 = vadd.f32 %v1708_v43, %v519_v60  ;;  %v590_v35 = vsub.f32 0.0, %v574_v27  ;;  %v551_v44 = vmax.f32 %v1713_v49, 0.0 }
 0x13c   : > { %v600_v63 = vmul.f32 1.442695, %v583_v55  ;;  %v455_v1 = vpop.f32.mrb[5].mxu0  ;;  %v1727_v2 = vpop.f32.mrb[5].mxu1  ;;  %v569_v5 = vand.u32 2147483647, %v1725_v0  ;;  %v522_v17 = vmul.f32 %v1150_v61, %v1706_v41  ;;  %v1777_v55 = vadd.f32 %v1708_v43, %v527_v38 }
 0x13d   : > { %v598_v3 = vmul.f32 1.442695, %v582_v59  ;;  %v568_v6 = vand.u32 2147483647, %v1730_v4  ;;  %v521_v25 = vmul.f32 %v1706_v41, %v455_v1  ;;  %v616_v40 = vmul.f32 1.442695, %v591_v29 }
 0x13e   : > { %1309 = vpow2.f32 %v600_v63  ;;  %v585_v8 = vsub.f32 0.0, %v569_v5  ;;  %v1752_v21 = vadd.f32 %v1708_v43, %v522_v17  ;;  %v550_v51 = vmax.f32 %v1716_v50, 0.0 }
 0x13f   : > { %v1734_v7 = vpop.f32.mrb[6].mxu0  ;;  %1311 = vpow2.f32 %v598_v3  ;;  %v1736_v9 = vpop.f32.mrb[6].mxu1  ;;  %v584_v12 = vsub.f32 0.0, %v568_v6  ;;  %v1762_v33 = vadd.f32 %v1708_v43, %v521_v25  ;;  %v614_v53 = vmul.f32 1.442695, %v590_v35 }
 0x140   : > { %v1738_v10 = vpop.f32.mrb[7].mxu0  ;;  %v1741_v13 = vpop.f32.mrb[7].mxu1  ;;  %v604_v14 = vmul.f32 1.442695, %v585_v8  ;;  %v571_v28 = vand.u32 2147483647, %v1752_v21  ;;  %v529_v60 = vmul.f32 %v1706_v41, %v1727_v2  ;;  %v524_v11 = vmul.f32 %v1734_v7, %v1706_v41 }
 0x141   : > { %v602_v16 = vmul.f32 1.442695, %v584_v12  ;;  %v570_v47 = vand.u32 2147483647, %v1762_v33  ;;  %v553_v54 = vmax.f32 %v1725_v0, 0.0  ;;  %v530_v17 = vmul.f32 %v1722_v62, %v1706_v41 }
 0x142   : > { %1313 = vpow2.f32 %v604_v14  ;;  %v587_v39 = vsub.f32 0.0, %v571_v28  ;;  %v577_v59 = vand.u32 2147483647, %v1769_v42  ;;  %v576_v2 = vand.u32 2147483647, %v1777_v55 }
 0x143   : > { %1315 = vpow2.f32 %v602_v16  ;;  %v586_v3 = vsub.f32 0.0, %v570_v47  ;;  %v1790_v23 = vadd.f32 %v1708_v43, %v529_v60  ;;  %v1794_v27 = vadd.f32 %v1708_v43, %v524_v11 }
 0x144   : > { %v608_v56 = vmul.f32 1.442695, %v587_v39  ;;  %v552_v29 = vmax.f32 %v1730_v4, 0.0  ;;  %v523_v62 = vmul.f32 %v1706_v41, %v1738_v10  ;;  %v1801_v35 = vadd.f32 %v1708_v43, %v530_v17 }
 0x145   : > { %v606_v15 = vmul.f32 1.442695, %v586_v3  ;;  %v554_v10 = vmax.f32 %v1762_v33, 0.0 }
 0x148   : > { %v1310_v20 = vpop.eup %1309 }
 0x149   : > { %v639_v22 = vadd.f32 1.0, %v1310_v20  ;;  %v1312_v24 = vpop.eup %1311  ;;  %v642_v32 = vmul.f32 -0.5, %v1310_v20  ;;  %v645_v48 = vand.u32 2147483647, %v1310_v20 }
 0x14a   : > { %v630_v26 = vadd.f32 1.0, %v1312_v24  ;;  %v633_v34 = vmul.f32 -0.5, %v1312_v24  ;;  %v636_v58 = vand.u32 2147483647, %v1312_v24 }
 0x14b   : > { %1317 = vlog2.f32 %v639_v22  ;;  %v643_v45 = vadd.f32 1.0, %v642_v32  ;;  %vm646_vm2 = vcmp.lt.f32.partialorder %v645_v48, 0.0004427343 }
 0x14c   : > { %1319 = vlog2.f32 %v630_v26  ;;  %v1759_v31 = vpop.eup %1313  ;;  %v634_v52 = vadd.f32 1.0, %v633_v34  ;;  %vm637_vm3 = vcmp.lt.f32.partialorder %v636_v58, 0.0004427343  ;;  %v593_v34 = vsub.f32 0.0, %v577_v59 }
 0x14d   : > { %v657_v36 = vadd.f32 1.0, %v1759_v31  ;;  %v1765_v37 = vpop.eup %1315  ;;  %v644_v63 = vmul.f32 %v1310_v20, %v643_v45  ;;  %v660_v1 = vmul.f32 -0.5, %v1759_v31  ;;  %v663_v7 = vand.u32 2147483647, %v1759_v31 }
 0x14e   : > { %v648_v46 = vadd.f32 1.0, %v1765_v37  ;;  %v635_v6 = vmul.f32 %v1312_v24, %v634_v52  ;;  %v651_v8 = vmul.f32 -0.5, %v1765_v37  ;;  %v654_v30 = vand.u32 2147483647, %v1765_v37 }
 0x14f   : > { %1321 = vlog2.f32 %v657_v36  ;;  %v661_v22 = vadd.f32 1.0, %v660_v1  ;;  %v532_v36 = vmul.f32 %v1736_v9, %v1706_v41  ;;  %v573_v45 = vand.u32 2147483647, %v1794_v27 }
 0x150   : > { %1323 = vlog2.f32 %v648_v46  ;;  %v652_v26 = vadd.f32 1.0, %v651_v8  ;;  %vm1810_vm4 = vcmp.lt.f32.partialorder %v663_v7, 0.0004427343  ;;  %vm655_vm5 = vcmp.lt.f32.partialorder %v654_v30, 0.0004427343 }
 0x151   : > { %1325 = vpow2.f32 %v616_v40  ;;  %v662_v39 = vmul.f32 %v1759_v31, %v661_v22  ;;  %v592_v40 = vsub.f32 0.0, %v576_v2  ;;  %v589_v31 = vsub.f32 0.0, %v573_v45 }
 0x152   : > { %1327 = vpow2.f32 %v608_v56  ;;  %v653_v48 = vmul.f32 %v1765_v37, %v652_v26  ;;  %v531_v52 = vmul.f32 %v1706_v41, %v1741_v13  ;;  %v1824_v58 = vadd.f32 %v1708_v43, %v532_v36 }
 0x153   : > { %1329 = vpow2.f32 %v606_v15  ;;  %v618_v60 = vmul.f32 1.442695, %v592_v40  ;;  %v620_v3 = vmul.f32 1.442695, %v593_v34 }
 0x154   : > { %1331 = vpow2.f32 %v614_v53  ;;  %v1830_v8 = vadd.f32 %v1708_v43, %v531_v52 }
 0x155   : > { %v1318_v57 = vpop.eup %1317 }
 0x156   : > { %v641_v61 = vmul.f32 0.6931472, %v1318_v57  ;;  %v1320_v5 = vpop.eup %1319  ;;  %v579_v57 = vand.u32 2147483647, %v1801_v35  ;;  %v580_v2 = vand.u32 2147483647, %v1830_v8 }
 0x157   : > { %v632_v14 = vmul.f32 0.6931472, %v1320_v5 }
 0x158   : > { %v647_v12 = vsel %vm646_vm2, %v644_v63, %v641_v61  ;;  %v612_v61 = vmul.f32 1.442695, %v589_v31  ;;  %v595_v11 = vsub.f32 0.0, %v579_v57 }
 0x159   : > { %v775_v16 = vadd.f32 %v647_v12, %v551_v44  ;;  %v638_v20 = vsel %vm637_vm3, %v635_v6, %v632_v14  ;;  %v1322_v24 = vpop.eup %1321  ;;  %v578_v44 = vand.u32 2147483647, %v1790_v23  ;;  %v581_v14 = vand.u32 2147483647, %v1824_v58 }
 0x15a   : > { %v774_v25 = vadd.f32 %v638_v20, %v550_v51  ;;  %v659_v28 = vmul.f32 0.6931472, %v1322_v24  ;;  %v1324_v38 = vpop.eup %1323  ;;  %v1816_v51 = vadd.f32 %v1708_v43, %v523_v62  ;;  %1333 = vpow2.f32 %v612_v61 }
 0x15b   : > { %v1808_v46 = vpop.eup %1325  ;;  %v650_v47 = vmul.f32 0.6931472, %v1324_v38  ;;  %v594_v6 = vsub.f32 0.0, %v578_v44  ;;  %v624_v17 = vmul.f32 1.442695, %v595_v11  ;;  %v597_v20 = vsub.f32 0.0, %v581_v14 }
 0x15c   : > { %v790_v32 = vadd.f32 %v775_v16, %v774_v25  ;;  %v665_v9 = vsel %vm1810_vm4, %v662_v39, %v659_v28  ;;  %v1328_v59 = vpop.eup %1327  ;;  %v572_v63 = vand.u32 2147483647, %v1816_v51  ;;  %v596_v25 = vsub.f32 0.0, %v580_v2 }
 0x15d   : > { %v656_v56 = vsel %vm655_vm5, %v653_v48, %v650_v47  ;;  %v777_v1 = vadd.f32 %v665_v9, %v553_v54  ;;  %v675_v5 = vadd.f32 1.0, %v1328_v59  ;;  %v1330_v41 = vpop.eup %1329  ;;  %v622_v16 = vmul.f32 1.442695, %v594_v6 }
 0x15e   : > { %v776_v37 = vadd.f32 %v656_v56, %v552_v29  ;;  %v588_v53 = vsub.f32 0.0, %v572_v63  ;;  %v666_v12 = vadd.f32 1.0, %v1330_v41  ;;  %v678_v22 = vmul.f32 -0.5, %v1328_v59  ;;  %v1834_v43 = vpop.eup %1331 }
 0x15f   : > { %1335 = vlog2.f32 %v675_v5  ;;  %v669_v24 = vmul.f32 -0.5, %v1330_v41  ;;  %v628_v7 = vmul.f32 1.442695, %v597_v20  ;;  %v626_v26 = vmul.f32 1.442695, %v596_v25 }
 0x160   : > { %v791_v13 = vadd.f32 %v790_v32, %v776_v37  ;;  %1337 = vpow2.f32 %v618_v60  ;;  %v610_v54 = vmul.f32 1.442695, %v588_v53  ;;  %v702_v29 = vadd.f32 1.0, %v1834_v43 }
 0x161   : > { %1339 = vlog2.f32 %v666_v12  ;;  %v679_v30 = vadd.f32 1.0, %v678_v22  ;;  %v670_v62 = vadd.f32 1.0, %v669_v24  ;;  %v681_v34 = vand.u32 2147483647, %v1328_v59 }
 0x162   : > { %v792_v15 = vadd.f32 %v791_v13, %v777_v1  ;;  %1341 = vpow2.f32 %v620_v3  ;;  %v672_v36 = vand.u32 2147483647, %v1330_v41  ;;  %v711_v45 = vadd.f32 1.0, %v1808_v46 }
 0x163   : > { %1343 = vpow2.f32 %v610_v54  ;;  %v680_v48 = vmul.f32 %v1328_v59, %v679_v30  ;;  %v671_v31 = vmul.f32 %v1330_v41, %v670_v62  ;;  %v714_v56 = vmul.f32 -0.5, %v1808_v46 }
 0x164   : > { %1345 = vpow2.f32 %v622_v16  ;;  %v1836_v28 = vpop.eup %1333  ;;  %vm682_vm6 = vcmp.lt.f32.partialorder %v681_v34, 0.0004427343  ;;  %vm673_vm7 = vcmp.lt.f32.partialorder %v672_v36, 0.0004427343  ;;  %v555_v59 = vmax.f32 %v1752_v21, 0.0 }
 0x165   : > { %1347 = vpow2.f32 %v624_v17  ;;  %v693_v38 = vadd.f32 1.0, %v1836_v28  ;;  %v705_v6 = vmul.f32 -0.5, %v1834_v43  ;;  %v715_v53 = vadd.f32 1.0, %v714_v56 }
 0x166   : > { %1349 = vpow2.f32 %v626_v26  ;;  %v717_v11 = vand.u32 2147483647, %v1808_v46  ;;  %v708_v16 = vand.u32 2147483647, %v1834_v43  ;;  %v696_v54 = vmul.f32 -0.5, %v1836_v28 }
 0x167   : > { %1351 = vpow2.f32 %v628_v7  ;;  %v559_v20 = vmax.f32 %v1746_v18, 0.0  ;;  %v558_v22 = vmax.f32 %v1749_v19, 0.0  ;;  %v706_v25 = vadd.f32 1.0, %v705_v6 }
 0x168   : > { %1353 = vlog2.f32 %v693_v38  ;;  %v561_v7 = vmax.f32 %v1769_v42, 0.0  ;;  %vm1873_vm8 = vcmp.lt.f32.partialorder %v717_v11, 0.0004427343  ;;  %v716_v38 = vmul.f32 %v1808_v46, %v715_v53 }
 0x169   : > { %v1336_v32 = vpop.eup %1335  ;;  %1355 = vlog2.f32 %v702_v29  ;;  %v560_v29 = vmax.f32 %v1777_v55, 0.0  ;;  %vm1880_vm9 = vcmp.lt.f32.partialorder %v708_v16, 0.0004427343  ;;  %v707_v56 = vmul.f32 %v1834_v43, %v706_v25 }
 0x16a   : > { %v1840_v39 = vpop.eup %1337  ;;  %v677_v40 = vmul.f32 0.6931472, %v1336_v32  ;;  %1357 = vlog2.f32 %v711_v45  ;;  %v556_v11 = vmax.f32 %v1816_v51, 0.0  ;;  %v557_v25 = vmax.f32 %v1794_v27, 0.0 }
 0x16b   : > { %v1340_v44 = vpop.eup %1339  ;;  %v720_v57 = vadd.f32 1.0, %v1840_v39  ;;  %v723_v32 = vmul.f32 -0.5, %v1840_v39 }
 0x16c   : > { %v1844_v47 = vpop.eup %1341  ;;  %v668_v9 = vmul.f32 0.6931472, %v1340_v44  ;;  %v683_v37 = vsel %vm682_vm6, %v680_v48, %v677_v40  ;;  %v697_v44 = vadd.f32 1.0, %v696_v54 }
 0x16d   : > { %v1846_v52 = vpop.eup %1343  ;;  %v729_v3 = vadd.f32 1.0, %v1844_v47  ;;  %v779_v41 = vadd.f32 %v683_v37, %v555_v59  ;;  %v732_v26 = vmul.f32 -0.5, %v1844_v47  ;;  %v735_v37 = vand.u32 2147483647, %v1844_v47 }
 0x16e   : > { %v674_v60 = vsel %vm673_vm7, %v671_v31, %v668_v9  ;;  %v684_v61 = vadd.f32 1.0, %v1846_v52  ;;  %v1851_v63 = vpop.eup %1345  ;;  %v687_v2 = vmul.f32 -0.5, %v1846_v52  ;;  %v690_v48 = vand.u32 2147483647, %v1846_v52 }
 0x16f   : > { %v778_v1 = vadd.f32 %v674_v60, %v554_v10  ;;  %v1855_v5 = vpop.eup %1347  ;;  %v738_v12 = vadd.f32 1.0, %v1851_v63  ;;  %v699_v10 = vand.u32 2147483647, %v1836_v28  ;;  %v724_v59 = vadd.f32 1.0, %v723_v32 }
 0x170   : > { %1359 = vlog2.f32 %v684_v61  ;;  %v1860_v14 = vpop.eup %1349  ;;  %v688_v45 = vadd.f32 1.0, %v687_v2  ;;  %v698_v6 = vmul.f32 %v1836_v28, %v697_v44  ;;  %vm691_vm11 = vcmp.lt.f32.partialorder %v690_v48, 0.0004427343 }
 0x171   : > { %v793_v13 = vadd.f32 %v792_v15, %v778_v1  ;;  %1361 = vlog2.f32 %v720_v57  ;;  %v747_v15 = vadd.f32 1.0, %v1855_v5  ;;  %v1868_v24 = vpop.eup %1351  ;;  %v756_v34 = vadd.f32 1.0, %v1860_v14 }
 0x172   : > { %1363 = vlog2.f32 %v729_v3  ;;  %v1354_v30 = vpop.eup %1353  ;;  %v765_v9 = vadd.f32 1.0, %v1868_v24  ;;  %v733_v57 = vadd.f32 1.0, %v732_v26  ;;  %v726_v1 = vand.u32 2147483647, %v1840_v39 }
 0x173   : > { %v794_v17 = vadd.f32 %v793_v13, %v779_v41  ;;  %1365 = vlog2.f32 %v738_v12  ;;  %v1356_v36 = vpop.eup %1355  ;;  %v695_v46 = vmul.f32 0.6931472, %v1354_v30  ;;  %v741_v3 = vmul.f32 -0.5, %v1851_v63 }
 0x174   : > { %1367 = vlog2.f32 %v747_v15  ;;  %v1358_v31 = vpop.eup %1357  ;;  %v704_v61 = vmul.f32 0.6931472, %v1356_v36  ;;  %v689_v13 = vmul.f32 %v1846_v52, %v688_v45  ;;  %vm1893_vm10 = vcmp.lt.f32.partialorder %v699_v10, 0.0004427343 }
 0x175   : > { %1369 = vlog2.f32 %v756_v34  ;;  %v713_v12 = vmul.f32 0.6931472, %v1358_v31  ;;  %v701_v16 = vsel %vm1893_vm10, %v698_v6, %v695_v46  ;;  %v750_v2 = vmul.f32 -0.5, %v1855_v5 }
 0x176   : > { %1371 = vlog2.f32 %v765_v9  ;;  %v734_v15 = vmul.f32 %v1844_v47, %v733_v57  ;;  %v725_v52 = vmul.f32 %v1840_v39, %v724_v59  ;;  %v710_v30 = vsel %vm1880_vm9, %v707_v56, %v704_v61 }
 0x177   : > { %v742_v34 = vadd.f32 1.0, %v741_v3  ;;  %v759_v36 = vmul.f32 -0.5, %v1860_v14  ;;  %vm1907_vm12 = vcmp.lt.f32.partialorder %v726_v1, 0.0004427343  ;;  %v744_v10 = vand.u32 2147483647, %v1851_v63 }
 0x178   : > { %v781_v47 = vadd.f32 %v701_v16, %v557_v25  ;;  %v719_v39 = vsel %vm1873_vm8, %v716_v38, %v713_v12  ;;  %v751_v31 = vadd.f32 1.0, %v750_v2  ;;  %v768_v40 = vmul.f32 -0.5, %v1868_v24 }
 0x179   : > { %v782_v57 = vadd.f32 %v710_v30, %v558_v22  ;;  %vm1917_vm13 = vcmp.lt.f32.partialorder %v735_v37, 0.0004427343  ;;  %v753_v61 = vand.u32 2147483647, %v1855_v5  ;;  %v743_v38 = vmul.f32 %v1851_v63, %v742_v34 }
 0x17a   : > { %v1360_v60 = vpop.eup %1359  ;;  %v760_v59 = vadd.f32 1.0, %v759_v36  ;;  %v783_v3 = vadd.f32 %v719_v39, %v559_v20  ;;  %vm1927_vm14 = vcmp.lt.f32.partialorder %v744_v10, 0.0004427343  ;;  %v762_v6 = vand.u32 2147483647, %v1860_v14 }
 0x17b   : > { %v686_v41 = vmul.f32 0.6931472, %v1360_v60  ;;  %v1362_v53 = vpop.eup %1361  ;;  %v769_v43 = vadd.f32 1.0, %v768_v40  ;;  %vm1937_vm15 = vcmp.lt.f32.partialorder %v753_v61, 0.0004427343  ;;  %v563_v30 = vmax.f32 %v1801_v35, 0.0 }
 0x17c   : > { %v1364_v28 = vpop.eup %1363  ;;  %v722_v32 = vmul.f32 0.6931472, %v1362_v53  ;;  %v752_v53 = vmul.f32 %v1855_v5, %v751_v31  ;;  %v771_v12 = vand.u32 2147483647, %v1868_v24  ;;  %vm763_vm0 = vcmp.lt.f32.partialorder %v762_v6, 0.0004427343 }
 0x17d   : > { %v692_v54 = vsel %vm691_vm11, %v689_v13, %v686_v41  ;;  %v1366_v44 = vpop.eup %1365  ;;  %v731_v9 = vmul.f32 0.6931472, %v1364_v28  ;;  %v761_v28 = vmul.f32 %v1860_v14, %v760_v59  ;;  %v565_v10 = vmax.f32 %v1824_v58, 0.0 }
 0x17e   : > { %v780_v26 = vadd.f32 %v692_v54, %v556_v11  ;;  %v1368_v56 = vpop.eup %1367  ;;  %v740_v62 = vmul.f32 0.6931472, %v1366_v44  ;;  %vm772_vm1 = vcmp.lt.f32.partialorder %v771_v12, 0.0004427343 }
 0x17f   : > { %v1370_v1 = vpop.eup %1369  ;;  %v737_v41 = vsel %vm1917_vm13, %v734_v15, %v731_v9  ;;  %v749_v13 = vmul.f32 0.6931472, %v1368_v56  ;;  %v562_v15 = vmax.f32 %v1790_v23, 0.0 }
 0x180   : > { %v795_v48 = vadd.f32 %v794_v17, %v780_v26  ;;  %v728_v17 = vsel %vm1907_vm12, %v725_v52, %v722_v32  ;;  %v1372_v63 = vpop.eup %1371  ;;  %v746_v54 = vsel %vm1927_vm14, %v743_v38, %v740_v62  ;;  %v758_v2 = vmul.f32 0.6931472, %v1370_v1 }
 0x181   : > { %v784_v11 = vadd.f32 %v728_v17, %v560_v29  ;;  %v785_v5 = vadd.f32 %v737_v41, %v561_v7  ;;  %v755_v52 = vsel %vm1937_vm15, %v752_v53, %v749_v13  ;;  %v767_v25 = vmul.f32 0.6931472, %v1372_v63 }
 0x182   : > { %v796_v60 = vadd.f32 %v795_v48, %v781_v47  ;;  %v770_v26 = vmul.f32 %v1868_v24, %v769_v43  ;;  %v786_v32 = vadd.f32 %v746_v54, %v562_v15  ;;  %v764_v14 = vsel %vm763_vm0, %v761_v28, %v758_v2 }
 0x183   : > { %v564_v7 = vmax.f32 %v1830_v8, 0.0  ;;  %v787_v36 = vadd.f32 %v755_v52, %v563_v30  ;;  %v828_v17 = vlaneseq (!%p824_p4)  ;;  %v1980_v1 = vstv (!%p824_p4), %s1956_s9 }
 0x184   : > { %v797_v37 = vadd.f32 %v796_v60, %v782_v57  ;;  %v773_v45 = vsel %vm772_vm1, %v770_v26, %v767_v25 }
 0x185   : > { %v788_v47 = vadd.f32 %v764_v14, %v564_v7  ;;  %v789_v39 = vadd.f32 %v773_v45, %v565_v10  ;;  %v829_v62 = vshrl.u32 (!%p824_p4), %v828_v17, 7  ;;  %v863_v59 = vand.u32 (!%p824_p4), 127, %v828_v17 }
 0x186   : > { %v798_v16 = vadd.f32 %v797_v37, %v783_v3  ;;  %v864_v3 = vstv (!%p824_p4), %s1072_s11 }
 0x187   : > { %v830_v38 = vadd.s32 (!%p824_p4), 8, %v829_v62  ;;  %v831_v22 = vadd.s32 (!%p824_p4), 16, %v829_v62  ;;  %v832_v37 = vadd.s32 (!%p824_p4), 24, %v829_v62  ;;  %v846_v6 = vadd.s32 (!%p824_p4), %v1980_v1, %v829_v62 }
 0x188   : > { %v799_v29 = vadd.f32 %v798_v16, %v784_v11  ;;  %v1984_v13 = vadd.s32 (!%p824_p4), %v864_v3, %v863_v59  ;;  %v833_v53 = vadd.s32 (!%p824_p4), 32, %v829_v62  ;;  %v834_v63 = vadd.s32 (!%p824_p4), 40, %v829_v62 }
 0x189   : > { %v847_v41 = vadd.s32 (!%p824_p4), %v1980_v1, %v830_v38  ;;  %v848_v43 = vadd.s32 (!%p824_p4), %v1980_v1, %v831_v22  ;;  %v849_v11 = vadd.s32 (!%p824_p4), %v1980_v1, %v832_v37  ;;  %v835_v20 = vadd.s32 (!%p824_p4), 48, %v829_v62 }
 0x18a   : > { %v800_v34 = vadd.f32 %v799_v29, %v785_v5  ;;  %vm866_vm2 = vcmp.eq.s32.totalorder (!%p824_p4), %v846_v6, %v1984_v13  ;;  %v850_v12 = vadd.s32 (!%p824_p4), %v1980_v1, %v833_v53  ;;  %v836_v2 = vadd.s32 (!%p824_p4), 56, %v829_v62 }
 0x18b   : > { %vm867_vm3 = vcmp.eq.s32.totalorder (!%p824_p4), %v847_v41, %v1984_v13  ;;  %vm868_vm4 = vcmp.eq.s32.totalorder (!%p824_p4), %v848_v43, %v1984_v13  ;;  %v882_v16 = vsel (!%p824_p4), %vm866_vm2, %v1716_v50, 0.0  ;;  %v851_v28 = vadd.s32 (!%p824_p4), %v1980_v1, %v834_v63 }
 0x18c   : > { %v801_v44 = vadd.f32 %v800_v34, %v786_v32  ;;  %v883_v54 = vsel (!%p824_p4), %vm867_vm3, %v1713_v49, 0.0  ;;  %vm869_vm5 = vcmp.eq.s32.totalorder (!%p824_p4), %v849_v11, %v1984_v13  ;;  %v884_v5 = vsel (!%p824_p4), %vm868_vm4, %v1730_v4, 0.0 }
 0x18d   : > { %v837_v15 = vadd.s32 (!%p824_p4), 64, %v829_v62  ;;  %v852_v29 = vadd.s32 (!%p824_p4), %v1980_v1, %v835_v20  ;;  %vm870_vm6 = vcmp.eq.s32.totalorder (!%p824_p4), %v850_v12, %v1984_v13  ;;  %v898_v52 = vadd.f32 (!%p824_p4), %v883_v54, %v882_v16 }
 0x18e   : > { %v802_v48 = vadd.f32 %v801_v44, %v787_v36  ;;  %v885_v25 = vsel (!%p824_p4), %vm869_vm5, %v1725_v0, 0.0  ;;  %v838_v26 = vadd.s32 (!%p824_p4), 72, %v829_v62  ;;  %v853_v50 = vadd.s32 (!%p824_p4), %v1980_v1, %v836_v2 }
 0x18f   : > { %vm871_vm7 = vcmp.eq.s32.totalorder (!%p824_p4), %v851_v28, %v1984_v13  ;;  %v899_v49 = vadd.f32 (!%p824_p4), %v898_v52, %v884_v5  ;;  %v886_v30 = vsel (!%p824_p4), %vm870_vm6, %v1762_v33, 0.0  ;;  %v839_v32 = vadd.s32 (!%p824_p4), 80, %v829_v62 }
 0x190   : > { %v803_v24 = vadd.f32 %v802_v48, %v788_v47  ;;  %v854_v34 = vadd.s32 (!%p824_p4), %v1980_v1, %v837_v15  ;;  %vm872_vm8 = vcmp.eq.s32.totalorder (!%p824_p4), %v852_v29, %v1984_v13  ;;  %v887_v14 = vsel (!%p824_p4), %vm871_vm7, %v1752_v21, 0.0 }
 0x191   : > { %v900_v4 = vadd.f32 (!%p824_p4), %v899_v49, %v885_v25  ;;  %v840_v7 = vadd.s32 (!%p824_p4), 88, %v829_v62  ;;  %v855_v36 = vadd.s32 (!%p824_p4), %v1980_v1, %v838_v26  ;;  %vm873_vm9 = vcmp.eq.s32.totalorder (!%p824_p4), %v853_v50, %v1984_v13 }
 0x192   : > { %v804_v9 = vadd.f32 %v803_v24, %v789_v39  ;;  %v888_v44 = vsel (!%p824_p4), %vm872_vm8, %v1816_v51, 0.0  ;;  %v841_v45 = vadd.s32 (!%p824_p4), 96, %v829_v62  ;;  %v856_v10 = vadd.s32 (!%p824_p4), %v1980_v1, %v839_v32 }
 0x193   : > { %v901_v0 = vadd.f32 (!%p824_p4), %v900_v4, %v886_v30  ;;  %vm874_vm10 = vcmp.eq.s32.totalorder (!%p824_p4), %v854_v34, %v1984_v13  ;;  %v889_v47 = vsel (!%p824_p4), %vm873_vm9, %v1794_v27, 0.0  ;;  %v842_v48 = vadd.s32 (!%p824_p4), 104, %v829_v62 }
 0x194   : > { %805 = vadd.xlane.f32.xlu0 %v804_v9  ;;  %v857_v39 = vadd.s32 (!%p824_p4), %v1980_v1, %v840_v7  ;;  %vm875_vm11 = vcmp.eq.s32.totalorder (!%p824_p4), %v855_v36, %v1984_v13  ;;  %v890_v24 = vsel (!%p824_p4), %vm874_vm10, %v1749_v19, 0.0  ;;  %v843_v9 = vadd.s32 (!%p824_p4), 112, %v829_v62 }
 0x195   : > { %v902_v33 = vadd.f32 (!%p824_p4), %v901_v0, %v887_v14  ;;  %vm876_vm12 = vcmp.eq.s32.totalorder (!%p824_p4), %v856_v10, %v1984_v13 }
 0x196   : > { %vm877_vm13 = vcmp.eq.s32.totalorder (!%p824_p4), %v857_v39, %v1984_v13 }
 0x197   : > { %v903_v21 = vadd.f32 (!%p824_p4), %v902_v33, %v888_v44 }
 0x199   : > { %v904_v51 = vadd.f32 (!%p824_p4), %v903_v21, %v889_v47 }
 0x19b   : > { %v905_v27 = vadd.f32 (!%p824_p4), %v904_v51, %v890_v24 }
 0x221   : > { %v806_v31 = vpop.xlane.xlu0 %805 }
 0x222   : > { %v807_v40 = vrot.slane %v806_v31, 4 }
 0x224   : > { %v808_v56 = vadd.f32 %v807_v40, %v806_v31  ;;  %v858_v31 = vadd.s32 (!%p824_p4), %v1980_v1, %v841_v45  ;;  %v891_v40 = vsel (!%p824_p4), %vm875_vm11, %v1746_v18, 0.0 }
 0x225   : > { %v906_v19 = vadd.f32 (!%p824_p4), %v905_v27, %v891_v40 }
 0x226   : > { %v809_v57 = vrot.slane %v808_v56, 2  ;;  %vm878_vm14 = vcmp.eq.s32.totalorder (!%p824_p4), %v858_v31, %v1984_v13 }
 0x228   : > { %v810_v46 = vadd.f32 %v809_v57, %v808_v56  ;;  %v844_v56 = vadd.s32 (!%p824_p4), 120, %v829_v62  ;;  %v859_v57 = vadd.s32 (!%p824_p4), %v1980_v1, %v842_v48  ;;  %v894_v62 = vsel (!%p824_p4), %vm878_vm14, %v1790_v23, 0.0 }
 0x22a   : > { %v811_v60 = vrot.slane %v810_v46, 1  ;;  %v861_v17 = vadd.s32 (!%p824_p4), %v1980_v1, %v844_v56  ;;  %vm879_vm15 = vcmp.eq.s32.totalorder (!%p824_p4), %v859_v57, %v1984_v13 }
 0x22b   : > { %v895_v59 = vsel (!%p824_p4), %vm879_vm15, %v1801_v35, 0.0 }
 0x22c   : > { %v812_v61 = vadd.f32 %v811_v60, %v810_v46  ;;  %v892_v46 = vsel (!%p824_p4), %vm876_vm12, %v1777_v55, 0.0  ;;  %v860_v60 = vadd.s32 (!%p824_p4), %v1980_v1, %v843_v9  ;;  %vm881_vm1 = vcmp.eq.s32.totalorder (!%p824_p4), %v861_v17, %v1984_v13 }
 0x22d   : > { %v907_v18 = vadd.f32 (!%p824_p4), %v906_v19, %v892_v46 }
 0x22e   : > { %1230 = vpush %v812_v61  ;;  %v893_v61 = vsel (!%p824_p4), %vm877_vm13, %v1769_v42, 0.0  ;;  %vm880_vm0 = vcmp.eq.s32.totalorder (!%p824_p4), %v860_v60, %v1984_v13  ;;  %v897_v42 = vsel (!%p824_p4), %vm881_vm1, %v1824_v58, 0.0 }
 0x22f   : > { %v908_v38 = vadd.f32 (!%p824_p4), %v907_v18, %v893_v61  ;;  %v896_v3 = vsel (!%p824_p4), %vm880_vm0, %v1830_v8, 0.0 }
 0x231   : > { %v909_v55 = vadd.f32 (!%p824_p4), %v908_v38, %v894_v62 }
 0x233   : > { %v910_v22 = vadd.f32 (!%p824_p4), %v909_v55, %v895_v59 }
 0x235   : > { %v911_v37 = vadd.f32 (!%p824_p4), %v910_v22, %v896_v3 }
 0x237   : > { %v912_v1 = vadd.f32 (!%p824_p4), %v911_v37, %v897_v42 }
 0x239   : > { %913 = vadd.xlane.f32.xlu0 (!%p824_p4), %v912_v1 }
 0x25c   : > { %827 = sbr.rel (%p824_p4) target bundleno = 776 (0x308), region = 44 }
 0x25f   : > { %s1231_s16 = spop %1230 }
 0x260   : > { %s815_s17 = sadd.f32 %s1231_s16, %s814_s23 }
 0x262   : > { %817 = sst [smem:[#allocation2]] %s815_s17 }
 0x263   : > { %s922_s1 = sld [smem:[#allocation2]] }
 0x2c6   : > { %v914_v6 = vpop.xlane.xlu0 %913 }
 0x2c7   : > { %v915_v41 = vrot.slane %v914_v6, 4 }
 0x2c9   : > { %v916_v53 = vadd.f32 %v915_v41, %v914_v6 }
 0x2cb   : > { %v917_v23 = vrot.slane %v916_v53, 2 }
 0x2cd   : > { %v918_v43 = vadd.f32 %v917_v23, %v916_v53 }
 0x2cf   : > { %v919_v63 = vrot.slane %v918_v43, 1 }
 0x2d1   : > { %v920_v11 = vadd.f32 %v919_v63, %v918_v43 }
 0x2d3   : > { %1232 = vpush %v920_v11 }
 0x304   : > { %s1233_s26 = spop %1232 }
 0x305   : > { %s923_s5 = ssub.f32 %s922_s1, %s1233_s26 }
 0x307   : > { %924 = sst [smem:[#allocation2]] %s923_s5 }
 0x308 PF: > { %p1073_p5 = scmp.ne.s32.totalorder %s1451_s22, 1 }
 0x309   : > { %s929_s6 = sld [smem:[#allocation2]] (!%p1073_p5) }
 0x30a   : > { %928 = sbr.rel (%p1073_p5) target bundleno = 785 (0x311), region = 48 }
 0x30f   : > { %v930_v35 = vstv (!%p1073_p5), %s929_s6 }
 0x310   : > { %931 = vst [vmem:[%s221_s18] sm:$0xff] (!%p1073_p5), %v930_v35 }
 0x311 PF: > { %s2039_s13 = scalar_lea.hbm %s2094_s4, %s1956_s9  ;;  %s946_s14 = sshll.u32 %s221_s18, 4  ;;  %s947_s14 = int_to_ptr.vmem [resolvable:$true] %s946_s14 }
 0x312   : > { %s933_s22 = scalar_lea.sflag [#allocation6], %s219_s8  ;;  %s1373_s15 = scalar_lea.vmem %s947_s14, 128 }
 0x313   : > { %p1374_p6 = scmp.ne.s32.totalorder %s947_s14, %s1373_s15  ;;  %s1470_s23 = smov [#allocation5]  }
 0x314   : > { %s1377_s16 = sshll.u32 %s1470_s23, 4  ;;  %s1378_s16 = int_to_ptr.vmem [resolvable:$false] %s1377_s16 }
 0x315   : > { %p1375_p7 = pnand %p1374_p6, %p1551_p3  ;;  %s1379_s17 = scalar_lea.vmem %s1378_s16, 256 }
 0x316   : > { %p1380_p10 = scmp.lt.s32.totalorder %s947_s14, %s1378_s16  ;;  %p1381_p11 = scmp.lt.s32.totalorder %s1379_s17, %s1373_s15 }
 0x317   : > { %p1376_p8 = pneg %p1375_p7 }
 0x318   : > { %p1382_p12 = por %p1381_p11, %p1380_p10 }
 0x31a   : > { %p1383_p13 = pnand %p1382_p12, %p1376_p8 }
 0x31c   : > { %1386 = shalt.err (!%p1383_p13)
}
 0x31d   : > { %s1387_s8 = scalar_lea.hbm %s2039_s13, 128  ;;  %s1391_s18 = scalar_lea.hbm %s2094_s4, 256 }
 0x31e   : > { %p1388_p0 = scmp.ne.s32.totalorder %s2039_s13, %s1387_s8  ;;  %p1392_p4 = scmp.lt.u32.totalorder %s2039_s13, %s2094_s4 }
 0x31f   : > { %p1393_p5 = scmp.lt.u32.totalorder %s1391_s18, %s1387_s8  ;;  %p1395_p7 = scmp.lt.u32.totalorder %s1387_s8, %s2039_s13 }
 0x320   : > { %p1389_p1 = pnand %p1388_p0, %p1551_p3 }
 0x321   : > { %p1394_p6 = por %p1393_p5, %p1392_p4 }
 0x322   : > { %p1390_p2 = pneg %p1389_p1 }
 0x323   : > { %p1396_p8 = por %p1395_p7, %p1394_p6 }
 0x325   : > { %p1397_p10 = pnand %p1396_p8, %p1390_p2 }
 0x327   : > { %1400 = shalt.err (!%p1397_p10)
}
 0x328   : > { %1236 = dma.vmem_to_hbm [thread:$0]  (%p1551_p3), %s947_s14, 128, %s2039_s13, %s933_s22  }
 0x329 PF: > { %p1243_p11 = scmp.ge.s32.totalorder %s1467_s0, 2  ;;  %s958_s5 = sand.u32 1, %s1439_s19  }
 0x32a   : > { %s959_s6 = scalar_lea.sflag [#allocation6], %s958_s5 }
 0x32b   : > { %p1239_p12 = pnand %p1243_p11, %p1561_p9 }
 0x32d   : > { %1434 = dma.done.wait (!%p1239_p12), %s959_s6, 128  }
 0x32e   : > { %1436 = vsyncadd (!%p1239_p12), %s959_s6, 4294967168  ;;  %s19_s0 = sadd.s32 1, %s1467_s0   ;;  %s2117_s19 = smov %s1443_s20 }
 0x32f   : > { %p16_p13 = scmp.ge.s32.totalorder %s19_s0, 6   ;;  %s2118_s20 = smov %s1447_s21 }
 0x330   : > { %s2119_s21 = smov %s1569_s7  ;;  %s2120_s22 = smov %s1459_s24 }
 0x331   : > { %s2121_s23 = smov %s1463_s25  ;;  %s2122_s24 = smov %s2125_s27 }
 0x332   : > { %s2123_s25 = smov %s2129_s28  ;;  %18 = sbr.rel (!%p16_p13) target bundleno = 8 (0x8), region = 88 }
 0x339   :  { %964 = vsyncpa [#allocation6], 1 }
 0x33a   :  { %966 = vsyncpa [#allocation6 + $0x1], 1 }

</bundles_post_ra>
